<compile_context>
chip_gen: v7x
topology: tpu7x:2x2x1
jax: 0.10.0
libtpu: 0.0.40
codegen_flags: <defaults>
</compile_context>

<pallas_src>
import functools

import jax
import jax.numpy as jnp
from jax import lax
from jax.experimental import pallas as pl
from jax.experimental.pallas import tpu as pltpu


def _rnn_kernel(T, BP, H,
                xp_ref,                      # (T*BP, 2E)  packed [x(t) | x(T-1-t)]
                w0_ref, whh0_ref, b0_ref,    # (2E, 2H) blkdiag, (2H, 2H) blkdiag, (1, 2H)
                w1a_ref, w1b_ref,            # (2H, 2H), (2H, 2H)  packed layer-1 proj weights
                whh1_ref, b1_ref,            # (2H, 2H) blkdiag, (1, 2H)
                wl_ref, bl_ref,              # (4H, 128), (1, 128)  lane-padded head
                out_ref,                     # (BP, 128) padded logits
                out0p_ref,                   # (T*BP, 2H) layer-0 outputs, packed step order
                out0r_ref):                  # (T*BP, 2H) layer-0 outputs, reversed step order
    """Whole bidirectional 2-layer RNN + final linear in one Pallas program."""
    H2 = 2 * H

    # ---------------- layer 0 ----------------
    # Hoisted, pre-packed input projection: row-block i = [fwd(t=i) | bwd(t=T-1-i)].
    proj0 = (jnp.dot(xp_ref[...], w0_ref[...], preferred_element_type=jnp.float32)
             + b0_ref[...])                                    # (T*BP, 2H)
    whh0 = whh0_ref[...]                                       # loaded once

    h0 = jnp.zeros((BP, H2), jnp.float32)                      # [h_fwd | h_bwd]
    for i in range(T):                                         # fully unrolled, static
        xin = proj0[i * BP:(i + 1) * BP, :]                    # single contiguous slice
        h0 = jnp.tanh(xin + jnp.dot(h0, whh0,
                                    preferred_element_type=jnp.float32))
        # Full-row aligned stores (8, 2H); stores are off the recurrence dep chain.
        out0p_ref[i * BP:(i + 1) * BP, :] = h0                 # [o_fwd(i)     | o_bwd(T-1-i)]
        out0r_ref[(T - 1 - i) * BP:(T - i) * BP, :] = h0       # [o_fwd(T-1-i) | o_bwd(i)] at row i
    # after the last step: h0 = [h_fwd(final) | h_bwd(final)] of layer 0

    # ---------------- layer 1 ----------------
    # Packed layer-1 projection from the two layer-0 slabs:
    #   row i = [ proj1_fwd(t=i) | proj1_bwd(t=T-1-i) ]
    proj1 = (jnp.dot(out0p_ref[...], w1a_ref[...], preferred_element_type=jnp.float32)
             + jnp.dot(out0r_ref[...], w1b_ref[...], preferred_element_type=jnp.float32)
             + b1_ref[...])                                    # (T*BP, 2H)
    whh1 = whh1_ref[...]

    h1 = jnp.zeros((BP, H2), jnp.float32)
    for i in range(T):
        xin = proj1[i * BP:(i + 1) * BP, :]
        h1 = jnp.tanh(xin + jnp.dot(h1, whh1,
                                    preferred_element_type=jnp.float32))

    # ---------------- head ----------------
    # h_n.permute(1,0,2).view(B, 4H) = [h0f | h0b | h1f | h1b] = [h0 | h1]
    hcat = jnp.concatenate([h0, h1], axis=-1)                  # (BP, 4H) -> 128 lanes
    out_ref[...] = (jnp.dot(hcat, wl_ref[...], preferred_element_type=jnp.float32)
                    + bl_ref[...])                             # (BP, 128) unmasked store


def _block_diag2(a, b):
    """[[a, 0], [0, b]] fused fwd/bwd weight."""
    za = jnp.zeros((a.shape[0], b.shape[1]), a.dtype)
    zb = jnp.zeros((b.shape[0], a.shape[1]), b.dtype)
    return jnp.concatenate(
        [jnp.concatenate([a, za], axis=1),
         jnp.concatenate([zb, b], axis=1)], axis=0)


@functools.partial(jax.jit, static_argnames=("hidden_size",))
def rnn_forward(tokens, params, hidden_size):
    # Embedding lookup + permute(1,0,2) are glue, done in plain JAX.
    emb = params["embedding"][tokens]                          # (B, T, E)
    x = jnp.transpose(emb, (1, 0, 2)).astype(jnp.float32)      # (T, B, E) time-major
    T, B, E = x.shape
    H = hidden_size
    O = params["wl"].shape[1]

    # Pad batch to a full sublane group so every per-step row block is aligned.
    BP = max(8, ((B + 7) // 8) * 8)
    x = jnp.pad(x, ((0, 0), (0, BP - B), (0, 0)))              # zero rows, sliced out later
    x_rev = x[::-1]                                            # time-reversed copy (XLA glue)
    x_packed = jnp.concatenate([x.reshape(T * BP, E),
                                x_rev.reshape(T * BP, E)], axis=-1)   # (T*BP, 2E)

    # Layer-0 fused weights: packed input -> block-diagonal projection weight.
    w0 = _block_diag2(params["wih0f"], params["wih0b"])                # (2E, 2H)
    b0 = jnp.concatenate([params["b0f"], params["b0b"]], axis=1)       # (1, 2H)
    whh0 = _block_diag2(params["whh0f"], params["whh0b"])              # (2H, 2H)

    # Layer-1 packed projection weights.  With
    #   out0p[i] = [o_fwd(i) | o_bwd(T-1-i)],  out0r[i] = [o_fwd(T-1-i) | o_bwd(i)],
    # proj1[i] = out0p[i] @ A + out0r[i] @ Bm + [b1f | b1b] where
    #   A  = [[w1f_top, 0], [0, w1b_bot]],  Bm = [[0, w1b_top], [w1f_bot, 0]].
    w1f, w1b = params["wih1f"], params["wih1b"]                        # (2H, H) each
    zH = jnp.zeros((H, H), jnp.float32)
    w1a = jnp.concatenate(
        [jnp.concatenate([w1f[:H], zH], axis=1),
         jnp.concatenate([zH, w1b[H:]], axis=1)], axis=0)              # (2H, 2H)
    w1bm = jnp.concatenate(
        [jnp.concatenate([zH, w1b[:H]], axis=1),
         jnp.concatenate([w1f[H:], zH], axis=1)], axis=0)              # (2H, 2H)
    b1 = jnp.concatenate([params["b1f"], params["b1b"]], axis=1)       # (1, 2H)
    whh1 = _block_diag2(params["whh1f"], params["whh1b"])              # (2H, 2H)

    # Lane-dense head: pad output lanes to 128 so the final store is unmasked.
    OP = 128
    wl = jnp.pad(params["wl"], ((0, 0), (0, OP - O)))                  # (4H, 128)
    bl = jnp.pad(params["bl"], ((0, 0), (0, OP - O)))                  # (1, 128)

    kernel = functools.partial(_rnn_kernel, T, BP, H)
    vmem = pl.BlockSpec(memory_space=pltpu.MemorySpace.VMEM)
    args = (x_packed, w0, whh0, b0, w1a, w1bm, whh1, b1, wl, bl)

    out = pl.pallas_call(
        kernel,
        out_shape=jax.ShapeDtypeStruct((BP, OP), jnp.float32),
        in_specs=[vmem] * len(args),
        out_specs=vmem,
        scratch_shapes=[pltpu.VMEM((T * BP, 2 * H), jnp.float32),
                        pltpu.VMEM((T * BP, 2 * H), jnp.float32)],
    )(*args)
    # Drop padded batch rows and padded output lanes.
    return out[:B, :O]


def rnn_reference(tokens, params, H):
    """Pure-JAX reference mirroring torch nn.RNN(bidirectional, num_layers=2)."""
    emb = params["embedding"][tokens]
    x = jnp.transpose(emb, (1, 0, 2)).astype(jnp.float32)      # (T, B, E)
    B = x.shape[1]

    def run_dir(xs, wih, whh, b, reverse):
        def step(h, xt):
            h = jnp.tanh(xt @ wih + h @ whh + b)
            return h, h
        h_last, outs = lax.scan(step, jnp.zeros((B, H), jnp.float32), xs,
                                reverse=reverse)
        return h_last, outs

    h0f, o0f = run_dir(x, params["wih0f"], params["whh0f"], params["b0f"], False)
    h0b, o0b = run_dir(x, params["wih0b"], params["whh0b"], params["b0b"], True)
    x1 = jnp.concatenate([o0f, o0b], axis=-1)                  # (T, B, 2H)
    h1f, _ = run_dir(x1, params["wih1f"], params["whh1f"], params["b1f"], False)
    h1b, _ = run_dir(x1, params["wih1b"], params["whh1b"], params["b1b"], True)
    hcat = jnp.concatenate([h0f, h0b, h1f, h1b], axis=-1)      # (B, 4H)
    return hcat @ params["wl"] + params["bl"]


def init_params(key, vocab_size, embedding_length, hidden_size, output_size):
    E, H, O = embedding_length, hidden_size, output_size
    ks = jax.random.split(key, 16)
    s = 1.0 / jnp.sqrt(jnp.float32(H))

    def u(k, shape, scale):
        return jax.random.uniform(k, shape, jnp.float32, -scale, scale)

    return {
        "embedding": jax.random.normal(ks[0], (vocab_size, E), jnp.float32),
        # layer 0 (input size E); weights pre-transposed to (in, out)
        "wih0f": u(ks[1], (E, H), s), "whh0f": u(ks[2], (H, H), s), "b0f": u(ks[3], (1, H), s),
        "wih0b": u(ks[4], (E, H), s), "whh0b": u(ks[5], (H, H), s), "b0b": u(ks[6], (1, H), s),
        # layer 1 (input size 2H = concat of both directions of layer 0)
        "wih1f": u(ks[7], (2 * H, H), s), "whh1f": u(ks[8], (H, H), s), "b1f": u(ks[9], (1, H), s),
        "wih1b": u(ks[10], (2 * H, H), s), "whh1b": u(ks[11], (H, H), s), "b1b": u(ks[12], (1, H), s),
        # label linear: 4H -> O
        "wl": u(ks[13], (4 * H, O), s), "bl": u(ks[14], (1, O), s),
    }


if __name__ == "__main__":
    batch_size = 2
    seq_len = 8
    vocab_size = 50
    embedding_length = 32
    hidden_size = 32
    output_size = 2

    key = jax.random.PRNGKey(0)
    k_tok, k_par = jax.random.split(key)
    tokens = jax.random.randint(k_tok, (batch_size, seq_len), 0, vocab_size,
                                dtype=jnp.int32)
    params = init_params(k_par, vocab_size, embedding_length, hidden_size,
                         output_size)

    logits = jax.block_until_ready(rnn_forward(tokens, params, hidden_size))
    assert logits.shape == (batch_size, output_size)

    ref = jax.block_until_ready(rnn_reference(tokens, params, hidden_size))
    assert jnp.allclose(logits, ref, atol=5e-3, rtol=5e-3), (logits, ref)

    print("KERNEL_OK")
</pallas_src>

<mosaic_0001>
module attributes {stable_mosaic.version = 11 : i64} {
  func.func @_rnn_kernel(%arg0: memref<64x64xf32, #tpu.memory_space<vmem>>, %arg1: memref<64x64xf32, #tpu.memory_space<vmem>>, %arg2: memref<64x64xf32, #tpu.memory_space<vmem>>, %arg3: memref<1x64xf32, #tpu.memory_space<vmem>>, %arg4: memref<64x64xf32, #tpu.memory_space<vmem>>, %arg5: memref<64x64xf32, #tpu.memory_space<vmem>>, %arg6: memref<64x64xf32, #tpu.memory_space<vmem>>, %arg7: memref<1x64xf32, #tpu.memory_space<vmem>>, %arg8: memref<128x128xf32, #tpu.memory_space<vmem>>, %arg9: memref<1x128xf32, #tpu.memory_space<vmem>>, %arg10: memref<8x128xf32, #tpu.memory_space<vmem>>, %arg11: memref<64x64xf32, #tpu.memory_space<vmem>>, %arg12: memref<64x64xf32, #tpu.memory_space<vmem>>) attributes {dimension_semantics = [], scalar_prefetch = 0 : i64, scratch_operands = 2 : i64, tpu.core_type = #tpu.core_type<tc>} {
    %c0 = arith.constant 0 : index
    %c0_0 = arith.constant 0 : index
    %0 = vector.load %arg0[%c0, %c0_0] : memref<64x64xf32, #tpu.memory_space<vmem>>, vector<64x64xf32>
    %c0_1 = arith.constant 0 : index
    %c0_2 = arith.constant 0 : index
    %1 = vector.load %arg1[%c0_1, %c0_2] : memref<64x64xf32, #tpu.memory_space<vmem>>, vector<64x64xf32>
    %cst = arith.constant dense<0.000000e+00> : vector<64x64xf32>
    %2 = tpu.matmul %0, %1, %cst {dimension_numbers = #tpu.dot_dimension_numbers<[1], [0], [0], [1], [0, 0, 1, 1], [], []>} : vector<64x64xf32>, vector<64x64xf32>, vector<64x64xf32> -> vector<64x64xf32>
    %c0_3 = arith.constant 0 : index
    %c0_4 = arith.constant 0 : index
    %3 = vector.load %arg3[%c0_3, %c0_4] : memref<1x64xf32, #tpu.memory_space<vmem>>, vector<1x64xf32>
    %4 = vector.broadcast %3 : vector<1x64xf32> to vector<64x64xf32>
    %5 = arith.addf %2, %4 : vector<64x64xf32>
    %c0_5 = arith.constant 0 : index
    %c0_6 = arith.constant 0 : index
    %6 = vector.load %arg2[%c0_5, %c0_6] : memref<64x64xf32, #tpu.memory_space<vmem>>, vector<64x64xf32>
    %cst_7 = arith.constant 0.000000e+00 : f32
    %7 = vector.broadcast %cst_7 : f32 to vector<8x64xf32>
    %8 = vector.extract_strided_slice %5 {offsets = [0, 0], sizes = [8, 64], strides = [1, 1]} : vector<64x64xf32> to vector<8x64xf32>
    %cst_8 = arith.constant dense<0.000000e+00> : vector<8x64xf32>
    %9 = tpu.matmul %7, %6, %cst_8 {dimension_numbers = #tpu.dot_dimension_numbers<[1], [0], [0], [1], [0, 0, 1, 1], [], []>} : vector<8x64xf32>, vector<64x64xf32>, vector<8x64xf32> -> vector<8x64xf32>
    %10 = arith.addf %8, %9 : vector<8x64xf32>
    %11 = math.tanh %10 : vector<8x64xf32>
    %c0_9 = arith.constant 0 : index
    %c0_10 = arith.constant 0 : index
    %12 = vector.load %arg11[%c0_9, %c0_10] : memref<64x64xf32, #tpu.memory_space<vmem>>, vector<8x64xf32>
    tpu.vector_store %arg11[%c0_9, %c0_10], %11 {strides = array<i32>} : memref<64x64xf32, #tpu.memory_space<vmem>>, vector<8x64xf32>,
    %c56 = arith.constant 56 : index
    %c0_11 = arith.constant 0 : index
    %13 = vector.load %arg12[%c56, %c0_11] : memref<64x64xf32, #tpu.memory_space<vmem>>, vector<8x64xf32>
    tpu.vector_store %arg12[%c56, %c0_11], %11 {strides = array<i32>} : memref<64x64xf32, #tpu.memory_space<vmem>>, vector<8x64xf32>,
    %14 = vector.extract_strided_slice %5 {offsets = [8, 0], sizes = [8, 64], strides = [1, 1]} : vector<64x64xf32> to vector<8x64xf32>
    %cst_12 = arith.constant dense<0.000000e+00> : vector<8x64xf32>
    %15 = tpu.matmul %11, %6, %cst_12 {dimension_numbers = #tpu.dot_dimension_numbers<[1], [0], [0], [1], [0, 0, 1, 1], [], []>} : vector<8x64xf32>, vector<64x64xf32>, vector<8x64xf32> -> vector<8x64xf32>
    %16 = arith.addf %14, %15 : vector<8x64xf32>
    %17 = math.tanh %16 : vector<8x64xf32>
    %c8 = arith.constant 8 : index
    %c0_13 = arith.constant 0 : index
    %18 = vector.load %arg11[%c8, %c0_13] : memref<64x64xf32, #tpu.memory_space<vmem>>, vector<8x64xf32>
    tpu.vector_store %arg11[%c8, %c0_13], %17 {strides = array<i32>} : memref<64x64xf32, #tpu.memory_space<vmem>>, vector<8x64xf32>,
    %c48 = arith.constant 48 : index
    %c0_14 = arith.constant 0 : index
    %19 = vector.load %arg12[%c48, %c0_14] : memref<64x64xf32, #tpu.memory_space<vmem>>, vector<8x64xf32>
    tpu.vector_store %arg12[%c48, %c0_14], %17 {strides = array<i32>} : memref<64x64xf32, #tpu.memory_space<vmem>>, vector<8x64xf32>,
    %20 = vector.extract_strided_slice %5 {offsets = [16, 0], sizes = [8, 64], strides = [1, 1]} : vector<64x64xf32> to vector<8x64xf32>
    %cst_15 = arith.constant dense<0.000000e+00> : vector<8x64xf32>
    %21 = tpu.matmul %17, %6, %cst_15 {dimension_numbers = #tpu.dot_dimension_numbers<[1], [0], [0], [1], [0, 0, 1, 1], [], []>} : vector<8x64xf32>, vector<64x64xf32>, vector<8x64xf32> -> vector<8x64xf32>
    %22 = arith.addf %20, %21 : vector<8x64xf32>
    %23 = math.tanh %22 : vector<8x64xf32>
    %c16 = arith.constant 16 : index
    %c0_16 = arith.constant 0 : index
    %24 = vector.load %arg11[%c16, %c0_16] : memref<64x64xf32, #tpu.memory_space<vmem>>, vector<8x64xf32>
    tpu.vector_store %arg11[%c16, %c0_16], %23 {strides = array<i32>} : memref<64x64xf32, #tpu.memory_space<vmem>>, vector<8x64xf32>,
    %c40 = arith.constant 40 : index
    %c0_17 = arith.constant 0 : index
    %25 = vector.load %arg12[%c40, %c0_17] : memref<64x64xf32, #tpu.memory_space<vmem>>, vector<8x64xf32>
    tpu.vector_store %arg12[%c40, %c0_17], %23 {strides = array<i32>} : memref<64x64xf32, #tpu.memory_space<vmem>>, vector<8x64xf32>,
    %26 = vector.extract_strided_slice %5 {offsets = [24, 0], sizes = [8, 64], strides = [1, 1]} : vector<64x64xf32> to vector<8x64xf32>
    %cst_18 = arith.constant dense<0.000000e+00> : vector<8x64xf32>
    %27 = tpu.matmul %23, %6, %cst_18 {dimension_numbers = #tpu.dot_dimension_numbers<[1], [0], [0], [1], [0, 0, 1, 1], [], []>} : vector<8x64xf32>, vector<64x64xf32>, vector<8x64xf32> -> vector<8x64xf32>
    %28 = arith.addf %26, %27 : vector<8x64xf32>
    %29 = math.tanh %28 : vector<8x64xf32>
    %c24 = arith.constant 24 : index
    %c0_19 = arith.constant 0 : index
    %30 = vector.load %arg11[%c24, %c0_19] : memref<64x64xf32, #tpu.memory_space<vmem>>, vector<8x64xf32>
    tpu.vector_store %arg11[%c24, %c0_19], %29 {strides = array<i32>} : memref<64x64xf32, #tpu.memory_space<vmem>>, vector<8x64xf32>,
    %c32 = arith.constant 32 : index
    %c0_20 = arith.constant 0 : index
    %31 = vector.load %arg12[%c32, %c0_20] : memref<64x64xf32, #tpu.memory_space<vmem>>, vector<8x64xf32>
    tpu.vector_store %arg12[%c32, %c0_20], %29 {strides = array<i32>} : memref<64x64xf32, #tpu.memory_space<vmem>>, vector<8x64xf32>,
    %32 = vector.extract_strided_slice %5 {offsets = [32, 0], sizes = [8, 64], strides = [1, 1]} : vector<64x64xf32> to vector<8x64xf32>
    %cst_21 = arith.constant dense<0.000000e+00> : vector<8x64xf32>
    %33 = tpu.matmul %29, %6, %cst_21 {dimension_numbers = #tpu.dot_dimension_numbers<[1], [0], [0], [1], [0, 0, 1, 1], [], []>} : vector<8x64xf32>, vector<64x64xf32>, vector<8x64xf32> -> vector<8x64xf32>
    %34 = arith.addf %32, %33 : vector<8x64xf32>
    %35 = math.tanh %34 : vector<8x64xf32>
    %c32_22 = arith.constant 32 : index
    %c0_23 = arith.constant 0 : index
    %36 = vector.load %arg11[%c32_22, %c0_23] : memref<64x64xf32, #tpu.memory_space<vmem>>, vector<8x64xf32>
    tpu.vector_store %arg11[%c32_22, %c0_23], %35 {strides = array<i32>} : memref<64x64xf32, #tpu.memory_space<vmem>>, vector<8x64xf32>,
    %c24_24 = arith.constant 24 : index
    %c0_25 = arith.constant 0 : index
    %37 = vector.load %arg12[%c24_24, %c0_25] : memref<64x64xf32, #tpu.memory_space<vmem>>, vector<8x64xf32>
    tpu.vector_store %arg12[%c24_24, %c0_25], %35 {strides = array<i32>} : memref<64x64xf32, #tpu.memory_space<vmem>>, vector<8x64xf32>,
    %38 = vector.extract_strided_slice %5 {offsets = [40, 0], sizes = [8, 64], strides = [1, 1]} : vector<64x64xf32> to vector<8x64xf32>
    %cst_26 = arith.constant dense<0.000000e+00> : vector<8x64xf32>
    %39 = tpu.matmul %35, %6, %cst_26 {dimension_numbers = #tpu.dot_dimension_numbers<[1], [0], [0], [1], [0, 0, 1, 1], [], []>} : vector<8x64xf32>, vector<64x64xf32>, vector<8x64xf32> -> vector<8x64xf32>
    %40 = arith.addf %38, %39 : vector<8x64xf32>
    %41 = math.tanh %40 : vector<8x64xf32>
    %c40_27 = arith.constant 40 : index
    %c0_28 = arith.constant 0 : index
    %42 = vector.load %arg11[%c40_27, %c0_28] : memref<64x64xf32, #tpu.memory_space<vmem>>, vector<8x64xf32>
    tpu.vector_store %arg11[%c40_27, %c0_28], %41 {strides = array<i32>} : memref<64x64xf32, #tpu.memory_space<vmem>>, vector<8x64xf32>,
    %c16_29 = arith.constant 16 : index
    %c0_30 = arith.constant 0 : index
    %43 = vector.load %arg12[%c16_29, %c0_30] : memref<64x64xf32, #tpu.memory_space<vmem>>, vector<8x64xf32>
    tpu.vector_store %arg12[%c16_29, %c0_30], %41 {strides = array<i32>} : memref<64x64xf32, #tpu.memory_space<vmem>>, vector<8x64xf32>,
    %44 = vector.extract_strided_slice %5 {offsets = [48, 0], sizes = [8, 64], strides = [1, 1]} : vector<64x64xf32> to vector<8x64xf32>
    %cst_31 = arith.constant dense<0.000000e+00> : vector<8x64xf32>
    %45 = tpu.matmul %41, %6, %cst_31 {dimension_numbers = #tpu.dot_dimension_numbers<[1], [0], [0], [1], [0, 0, 1, 1], [], []>} : vector<8x64xf32>, vector<64x64xf32>, vector<8x64xf32> -> vector<8x64xf32>
    %46 = arith.addf %44, %45 : vector<8x64xf32>
    %47 = math.tanh %46 : vector<8x64xf32>
    %c48_32 = arith.constant 48 : index
    %c0_33 = arith.constant 0 : index
    %48 = vector.load %arg11[%c48_32, %c0_33] : memref<64x64xf32, #tpu.memory_space<vmem>>, vector<8x64xf32>
    tpu.vector_store %arg11[%c48_32, %c0_33], %47 {strides = array<i32>} : memref<64x64xf32, #tpu.memory_space<vmem>>, vector<8x64xf32>,
    %c8_34 = arith.constant 8 : index
    %c0_35 = arith.constant 0 : index
    %49 = vector.load %arg12[%c8_34, %c0_35] : memref<64x64xf32, #tpu.memory_space<vmem>>, vector<8x64xf32>
    tpu.vector_store %arg12[%c8_34, %c0_35], %47 {strides = array<i32>} : memref<64x64xf32, #tpu.memory_space<vmem>>, vector<8x64xf32>,
    %50 = vector.extract_strided_slice %5 {offsets = [56, 0], sizes = [8, 64], strides = [1, 1]} : vector<64x64xf32> to vector<8x64xf32>
    %cst_36 = arith.constant dense<0.000000e+00> : vector<8x64xf32>
    %51 = tpu.matmul %47, %6, %cst_36 {dimension_numbers = #tpu.dot_dimension_numbers<[1], [0], [0], [1], [0, 0, 1, 1], [], []>} : vector<8x64xf32>, vector<64x64xf32>, vector<8x64xf32> -> vector<8x64xf32>
    %52 = arith.addf %50, %51 : vector<8x64xf32>
    %53 = math.tanh %52 : vector<8x64xf32>
    %c56_37 = arith.constant 56 : index
    %c0_38 = arith.constant 0 : index
    %54 = vector.load %arg11[%c56_37, %c0_38] : memref<64x64xf32, #tpu.memory_space<vmem>>, vector<8x64xf32>
    tpu.vector_store %arg11[%c56_37, %c0_38], %53 {strides = array<i32>} : memref<64x64xf32, #tpu.memory_space<vmem>>, vector<8x64xf32>,
    %c0_39 = arith.constant 0 : index
    %c0_40 = arith.constant 0 : index
    %55 = vector.load %arg12[%c0_39, %c0_40] : memref<64x64xf32, #tpu.memory_space<vmem>>, vector<8x64xf32>
    tpu.vector_store %arg12[%c0_39, %c0_40], %53 {strides = array<i32>} : memref<64x64xf32, #tpu.memory_space<vmem>>, vector<8x64xf32>,
    %c0_41 = arith.constant 0 : index
    %c0_42 = arith.constant 0 : index
    %56 = vector.load %arg11[%c0_41, %c0_42] : memref<64x64xf32, #tpu.memory_space<vmem>>, vector<64x64xf32>
    %c0_43 = arith.constant 0 : index
    %c0_44 = arith.constant 0 : index
    %57 = vector.load %arg4[%c0_43, %c0_44] : memref<64x64xf32, #tpu.memory_space<vmem>>, vector<64x64xf32>
    %cst_45 = arith.constant dense<0.000000e+00> : vector<64x64xf32>
    %58 = tpu.matmul %56, %57, %cst_45 {dimension_numbers = #tpu.dot_dimension_numbers<[1], [0], [0], [1], [0, 0, 1, 1], [], []>} : vector<64x64xf32>, vector<64x64xf32>, vector<64x64xf32> -> vector<64x64xf32>
    %c0_46 = arith.constant 0 : index
    %c0_47 = arith.constant 0 : index
    %59 = vector.load %arg12[%c0_46, %c0_47] : memref<64x64xf32, #tpu.memory_space<vmem>>, vector<64x64xf32>
    %c0_48 = arith.constant 0 : index
    %c0_49 = arith.constant 0 : index
    %60 = vector.load %arg5[%c0_48, %c0_49] : memref<64x64xf32, #tpu.memory_space<vmem>>, vector<64x64xf32>
    %cst_50 = arith.constant dense<0.000000e+00> : vector<64x64xf32>
    %61 = tpu.matmul %59, %60, %cst_50 {dimension_numbers = #tpu.dot_dimension_numbers<[1], [0], [0], [1], [0, 0, 1, 1], [], []>} : vector<64x64xf32>, vector<64x64xf32>, vector<64x64xf32> -> vector<64x64xf32>
    %62 = arith.addf %58, %61 : vector<64x64xf32>
    %c0_51 = arith.constant 0 : index
    %c0_52 = arith.constant 0 : index
    %63 = vector.load %arg7[%c0_51, %c0_52] : memref<1x64xf32, #tpu.memory_space<vmem>>, vector<1x64xf32>
    %64 = vector.broadcast %63 : vector<1x64xf32> to vector<64x64xf32>
    %65 = arith.addf %62, %64 : vector<64x64xf32>
    %c0_53 = arith.constant 0 : index
    %c0_54 = arith.constant 0 : index
    %66 = vector.load %arg6[%c0_53, %c0_54] : memref<64x64xf32, #tpu.memory_space<vmem>>, vector<64x64xf32>
    %cst_55 = arith.constant 0.000000e+00 : f32
    %67 = vector.broadcast %cst_55 : f32 to vector<8x64xf32>
    %68 = vector.extract_strided_slice %65 {offsets = [0, 0], sizes = [8, 64], strides = [1, 1]} : vector<64x64xf32> to vector<8x64xf32>
    %cst_56 = arith.constant dense<0.000000e+00> : vector<8x64xf32>
    %69 = tpu.matmul %67, %66, %cst_56 {dimension_numbers = #tpu.dot_dimension_numbers<[1], [0], [0], [1], [0, 0, 1, 1], [], []>} : vector<8x64xf32>, vector<64x64xf32>, vector<8x64xf32> -> vector<8x64xf32>
    %70 = arith.addf %68, %69 : vector<8x64xf32>
    %71 = math.tanh %70 : vector<8x64xf32>
    %72 = vector.extract_strided_slice %65 {offsets = [8, 0], sizes = [8, 64], strides = [1, 1]} : vector<64x64xf32> to vector<8x64xf32>
    %cst_57 = arith.constant dense<0.000000e+00> : vector<8x64xf32>
    %73 = tpu.matmul %71, %66, %cst_57 {dimension_numbers = #tpu.dot_dimension_numbers<[1], [0], [0], [1], [0, 0, 1, 1], [], []>} : vector<8x64xf32>, vector<64x64xf32>, vector<8x64xf32> -> vector<8x64xf32>
    %74 = arith.addf %72, %73 : vector<8x64xf32>
    %75 = math.tanh %74 : vector<8x64xf32>
    %76 = vector.extract_strided_slice %65 {offsets = [16, 0], sizes = [8, 64], strides = [1, 1]} : vector<64x64xf32> to vector<8x64xf32>
    %cst_58 = arith.constant dense<0.000000e+00> : vector<8x64xf32>
    %77 = tpu.matmul %75, %66, %cst_58 {dimension_numbers = #tpu.dot_dimension_numbers<[1], [0], [0], [1], [0, 0, 1, 1], [], []>} : vector<8x64xf32>, vector<64x64xf32>, vector<8x64xf32> -> vector<8x64xf32>
    %78 = arith.addf %76, %77 : vector<8x64xf32>
    %79 = math.tanh %78 : vector<8x64xf32>
    %80 = vector.extract_strided_slice %65 {offsets = [24, 0], sizes = [8, 64], strides = [1, 1]} : vector<64x64xf32> to vector<8x64xf32>
    %cst_59 = arith.constant dense<0.000000e+00> : vector<8x64xf32>
    %81 = tpu.matmul %79, %66, %cst_59 {dimension_numbers = #tpu.dot_dimension_numbers<[1], [0], [0], [1], [0, 0, 1, 1], [], []>} : vector<8x64xf32>, vector<64x64xf32>, vector<8x64xf32> -> vector<8x64xf32>
    %82 = arith.addf %80, %81 : vector<8x64xf32>
    %83 = math.tanh %82 : vector<8x64xf32>
    %84 = vector.extract_strided_slice %65 {offsets = [32, 0], sizes = [8, 64], strides = [1, 1]} : vector<64x64xf32> to vector<8x64xf32>
    %cst_60 = arith.constant dense<0.000000e+00> : vector<8x64xf32>
    %85 = tpu.matmul %83, %66, %cst_60 {dimension_numbers = #tpu.dot_dimension_numbers<[1], [0], [0], [1], [0, 0, 1, 1], [], []>} : vector<8x64xf32>, vector<64x64xf32>, vector<8x64xf32> -> vector<8x64xf32>
    %86 = arith.addf %84, %85 : vector<8x64xf32>
    %87 = math.tanh %86 : vector<8x64xf32>
    %88 = vector.extract_strided_slice %65 {offsets = [40, 0], sizes = [8, 64], strides = [1, 1]} : vector<64x64xf32> to vector<8x64xf32>
    %cst_61 = arith.constant dense<0.000000e+00> : vector<8x64xf32>
    %89 = tpu.matmul %87, %66, %cst_61 {dimension_numbers = #tpu.dot_dimension_numbers<[1], [0], [0], [1], [0, 0, 1, 1], [], []>} : vector<8x64xf32>, vector<64x64xf32>, vector<8x64xf32> -> vector<8x64xf32>
    %90 = arith.addf %88, %89 : vector<8x64xf32>
    %91 = math.tanh %90 : vector<8x64xf32>
    %92 = vector.extract_strided_slice %65 {offsets = [48, 0], sizes = [8, 64], strides = [1, 1]} : vector<64x64xf32> to vector<8x64xf32>
    %cst_62 = arith.constant dense<0.000000e+00> : vector<8x64xf32>
    %93 = tpu.matmul %91, %66, %cst_62 {dimension_numbers = #tpu.dot_dimension_numbers<[1], [0], [0], [1], [0, 0, 1, 1], [], []>} : vector<8x64xf32>, vector<64x64xf32>, vector<8x64xf32> -> vector<8x64xf32>
    %94 = arith.addf %92, %93 : vector<8x64xf32>
    %95 = math.tanh %94 : vector<8x64xf32>
    %96 = vector.extract_strided_slice %65 {offsets = [56, 0], sizes = [8, 64], strides = [1, 1]} : vector<64x64xf32> to vector<8x64xf32>
    %cst_63 = arith.constant dense<0.000000e+00> : vector<8x64xf32>
    %97 = tpu.matmul %95, %66, %cst_63 {dimension_numbers = #tpu.dot_dimension_numbers<[1], [0], [0], [1], [0, 0, 1, 1], [], []>} : vector<8x64xf32>, vector<64x64xf32>, vector<8x64xf32> -> vector<8x64xf32>
    %98 = arith.addf %96, %97 : vector<8x64xf32>
    %99 = math.tanh %98 : vector<8x64xf32>
    %100 = tpu.concatenate %53, %99 in 1 : vector<8x64xf32>, vector<8x64xf32> -> vector<8x128xf32>
    %c0_64 = arith.constant 0 : index
    %c0_65 = arith.constant 0 : index
    %101 = vector.load %arg8[%c0_64, %c0_65] : memref<128x128xf32, #tpu.memory_space<vmem>>, vector<128x128xf32>
    %cst_66 = arith.constant dense<0.000000e+00> : vector<8x128xf32>
    %102 = tpu.matmul %100, %101, %cst_66 {dimension_numbers = #tpu.dot_dimension_numbers<[1], [0], [0], [1], [0, 0, 1, 1], [], []>} : vector<8x128xf32>, vector<128x128xf32>, vector<8x128xf32> -> vector<8x128xf32>
    %c0_67 = arith.constant 0 : index
    %c0_68 = arith.constant 0 : index
    %103 = vector.load %arg9[%c0_67, %c0_68] : memref<1x128xf32, #tpu.memory_space<vmem>>, vector<1x128xf32>
    %104 = vector.broadcast %103 : vector<1x128xf32> to vector<8x128xf32>
    %105 = arith.addf %102, %104 : vector<8x128xf32>
    %c0_69 = arith.constant 0 : index
    %c0_70 = arith.constant 0 : index
    %106 = vector.load %arg10[%c0_69, %c0_70] : memref<8x128xf32, #tpu.memory_space<vmem>>, vector<8x128xf32>
    tpu.vector_store %arg10[%c0_69, %c0_70], %105 {strides = array<i32>} : memref<8x128xf32, #tpu.memory_space<vmem>>, vector<8x128xf32>,
    return
  }
}

</mosaic_0001>

<bundles_post_ra>
// kernel: rnn_forward.1
= control target key start
LH: loop header
LB: loop body
LE: loop exit
PB: predicated region body
PF: predicated region fallthrough
CT: control target
= control target key end

     0   :  { %v2806_v2 = vmov 0.0|0.0   ;;  %vm2807_vm0 = vmmov 0   ;;  %v2808_v4 = vmov 0.0   ;;  %vm58_vm1 = vcmask 523264   ;;  %s3345_s1 = inlined_call_operand.vmem [shape: f32[64,64], index: 1, kind: input, shape index: {}]   ;;  %s3346_s2 = inlined_call_operand.vmem [shape: f32[64,64], index: 2, kind: input, shape index: {}]   ;;  %s3347_s0 = inlined_call_operand.vmem [shape: f32[64,64], index: 0, kind: input, shape index: {}]   ;;  %s3348_s3 = inlined_call_operand.vmem [shape: f32[1,64], index: 3, kind: input, shape index: {}]   ;;  %s3349_s5 = inlined_call_operand.vmem [shape: f32[64,64], index: 5, kind: input, shape index: {}]   ;;  %s3350_s4 = inlined_call_operand.vmem [shape: f32[64,64], index: 4, kind: input, shape index: {}]   ;;  %s3351_s6 = inlined_call_operand.vmem [shape: f32[64,64], index: 6, kind: input, shape index: {}]   ;;  %s3352_s7 = inlined_call_operand.vmem [shape: f32[1,64], index: 7, kind: input, shape index: {}]   ;;  %s3353_s8 = inlined_call_operand.vmem [shape: f32[128,128], index: 8, kind: input, shape index: {}]   ;;  %s3354_s9 = inlined_call_operand.vmem [shape: f32[1,128], index: 9, kind: input, shape index: {}]   ;;  %s3355_s10 = inlined_call_operand.vmem [shape: f32[8,128], index: 10, kind: output, shape index: {}]  }
   0x1   :  { %v43_v0 = vld [vmem:[%s3345_s1] sm:$0xff]  ;;  %v44_v1 = vld [vmem:[%s3345_s1 + $0x8] sm:$0xff]  ;;  %2514 = vmatprep.subr.bf16.mxu1 %v2806_v2  ;;  %2119 = vmatprep.mubr.msk.f32.mxu1 %vm2807_vm0, %v2808_v4  ;;  %v45_v7 = vld [vmem:[%s3345_s1 + $0x10] sm:$0xff] }
   0x2   :  { %v188_v3 = vld [vmem:[%s3346_s2] sm:$0xff]  ;;  %v2498_v5 = vpack.c.bf16 %v44_v1, %v43_v0  ;;  %v189_v6 = vld [vmem:[%s3346_s2 + $0x8] sm:$0xff]  ;;  %v46_v8 = vld [vmem:[%s3345_s1 + $0x18] sm:$0xff] }
   0x3   :  { %v2886_v9 = vpack.c.bf16 %v189_v6, %v188_v3  ;;  %v2502_v10 = vpack.c.bf16 %v46_v8, %v45_v7  ;;  %v190_v11 = vld [vmem:[%s3346_s2 + $0x10] sm:$0xff]  ;;  %v191_v12 = vld [vmem:[%s3346_s2 + $0x18] sm:$0xff]  ;;  %v47_v13 = vld [vmem:[%s3345_s1 + $0x20] sm:$0xff] }
   0x4   :  { %2499 = vmatprep.subr.bf16.mxu0 %v2498_v5  ;;  %v48_v14 = vld [vmem:[%s3345_s1 + $0x28] sm:$0xff]  ;;  %v2901_v15 = vpack.c.bf16 %v191_v12, %v190_v11  ;;  %v35_v16 = vld [vmem:[%s3347_s0] sm:$0xff]  ;;  %v49_v20 = vld [vmem:[%s3345_s1 + $0x30] sm:$0xff] }
   0x5   :  { %2501 = vmatpush3.bf16.msra.mxu0 %v2498_v5  ;;  %2516 = vmatpush3.bf16.msra.mxu1 %v2886_v9  ;;  %v2506_v17 = vpack.c.bf16 %v48_v14, %v47_v13  ;;  %v192_v18 = vld [vmem:[%s3346_s2 + $0x20] sm:$0xff]  ;;  %v193_v19 = vld [vmem:[%s3346_s2 + $0x28] sm:$0xff]  ;;  %v50_v21 = vld [vmem:[%s3345_s1 + $0x38] sm:$0xff] }
   0x6   :  { %2503 = vmatprep.subr.bf16.mxu0 %v2502_v10  ;;  %2517 = vmatprep.subr.bf16.mxu1 %v2806_v2  ;;  %v2921_v22 = vpack.c.bf16 %v193_v19, %v192_v18  ;;  %v2510_v23 = vpack.c.bf16 %v50_v21, %v49_v20  ;;  %v194_v24 = vld [vmem:[%s3346_s2 + $0x30] sm:$0xff]  ;;  %v195_v25 = vld [vmem:[%s3346_s2 + $0x38] sm:$0xff]  ;;  %v36_v27 = vld [vmem:[%s3347_s0 + $0x8] sm:$0xff] }
   0x7   :  { %2091 = vmatprep.mubr.msk.f32.mxu0 %vm58_vm1, %v35_v16  ;;  %v2931_v26 = vpack.c.bf16 %v195_v25, %v194_v24  ;;  %v37_v28 = vld [vmem:[%s3347_s0 + $0x10] sm:$0xff]  ;;  %v38_v29 = vld [vmem:[%s3347_s0 + $0x18] sm:$0xff]  ;;  %v39_v30 = vld [vmem:[%s3347_s0 + $0x20] sm:$0xff] }
   0x8   :  { %v40_v31 = vld [vmem:[%s3347_s0 + $0x28] sm:$0xff]  ;;  %v41_v32 = vld [vmem:[%s3347_s0 + $0x30] sm:$0xff]  ;;  %v42_v33 = vld [vmem:[%s3347_s0 + $0x38] sm:$0xff] }
   0x9   :  { %2505 = vmatpush3.bf16.msra.mxu0 %v2502_v10  ;;  %2519 = vmatpush3.bf16.msra.mxu1 %v2901_v15  ;;  %v2989_v34 = vld [vmem:[%s3348_s3] ss:$0 sm:$0xff]  ;;  %v838_v19 = vld [vmem:[%s3349_s5 + $0x10] sm:$0xff]  ;;  %v839_v20 = vld [vmem:[%s3349_s5 + $0x18] sm:$0xff]  ;;  %s2809_s3 = smov 64  }
   0xa   :  { %2507 = vmatprep.subr.bf16.mxu0 %v2506_v17  ;;  %2520 = vmatprep.subr.bf16.mxu1 %v2806_v2  ;;  %v836_v16 = vld [vmem:[%s3349_s5] sm:$0xff]  ;;  %v2614_v21 = vpack.c.bf16 %v839_v20, %v838_v19  ;;  %v842_v25 = vld [vmem:[%s3349_s5 + $0x30] sm:$0xff] }
   0xd   :  { %2509 = vmatpush3.bf16.msra.mxu0 %v2506_v17  ;;  %2522 = vmatpush3.bf16.msra.mxu1 %v2921_v22  ;;  %v837_v17 = vld [vmem:[%s3349_s5 + $0x8] sm:$0xff] }
   0xe   :  { %2511 = vmatprep.subr.bf16.mxu0 %v2510_v23  ;;  %2523 = vmatprep.subr.bf16.mxu1 %v2806_v2  ;;  %v2610_v18 = vpack.c.bf16 %v837_v17, %v836_v16 }
  0x11   :  { %2513 = vmatpush3.bf16.msra.mxu0 %v2510_v23  ;;  %2525 = vmatpush3.bf16.msra.mxu1 %v2931_v26  ;;  %v841_v23 = vld [vmem:[%s3349_s5 + $0x28] sm:$0xff] }
  0x12   :  { %2526 = vmatprep.subr.bf16.mxu0 %v2806_v2  ;;  %2538 = vmatprep.subr.bf16.mxu1 %v2806_v2 }
  0x14   :  { %2092 = vmatmul.mubr.msk.f32.vlgmr.msra.gmra.mrb[0].mxu0 %vm58_vm1, %v36_v27  ;;  %2120 = vmatmul.mubr.f32.vlgmr.msra.gmra.mrb[0].mxu1 %v2808_v4 }
  0x15   :  { %2528 = vmatpush3.bf16.msra.mxu0 %v2886_v9  ;;  %2540 = vmatpush3.bf16.msra.mxu1 %v2886_v9 }
  0x16   :  { %2529 = vmatprep.subr.bf16.mxu0 %v2806_v2  ;;  %2541 = vmatprep.subr.bf16.mxu1 %v2806_v2 }
  0x17   :  { %2157 = vmatprep.mubr.msk.f32.mxu1 %vm2807_vm0, %v2808_v4  ;;  %2094 = vmatprep.mubr.msk.f32.mxu0 %vm58_vm1, %v37_v28  ;;  %v820_v28 = vld [vmem:[%s3350_s4] sm:$0xff] }
  0x18   :  { %2095 = vmatmul.mubr.msk.f32.gmra.mrb[2].mxu0 %vm58_vm1, %v38_v29  ;;  %v821_v29 = vld [vmem:[%s3350_s4 + $0x8] sm:$0xff] }
  0x19   :  { %2531 = vmatpush3.bf16.msra.mxu0 %v2901_v15  ;;  %2543 = vmatpush3.bf16.msra.mxu1 %v2901_v15 }
  0x1a   :  { %2532 = vmatprep.subr.bf16.mxu0 %v2806_v2  ;;  %2544 = vmatprep.subr.bf16.mxu1 %v2806_v2 }
  0x1b   :  { %2097 = vmatprep.mubr.msk.f32.mxu0 %vm58_vm1, %v39_v30  ;;  %v2626_v30 = vpack.c.bf16 %v821_v29, %v820_v28 }
  0x1c   :  { %2098 = vmatmul.mubr.msk.f32.gmra.mrb[4].mxu0 %vm58_vm1, %v40_v31  ;;  %v1117_v31 = vld [vmem:[%s3351_s6] sm:$0xff] }
  0x1d   :  { %2534 = vmatpush3.bf16.msra.mxu0 %v2921_v22  ;;  %2546 = vmatpush3.bf16.msra.mxu1 %v2921_v22 }
  0x1e   :  { %2535 = vmatprep.subr.bf16.mxu0 %v2806_v2  ;;  %2547 = vmatprep.subr.bf16.mxu1 %v2806_v2 }
  0x1f   :  { %2100 = vmatprep.mubr.msk.f32.mxu0 %vm58_vm1, %v41_v32  ;;  %v1118_v32 = vld [vmem:[%s3351_s6 + $0x8] sm:$0xff] }
  0x20   :  { %2101 = vmatmul.mubr.msk.f32.gmra.mrb[6].mxu0 %vm58_vm1, %v42_v33  ;;  %v3114_v33 = vpack.c.bf16 %v1118_v32, %v1117_v31 }
  0x21   :  { %2537 = vmatpush3.bf16.msra.mxu0 %v2931_v26  ;;  %2549 = vmatpush3.bf16.msra.mxu1 %v2931_v26 }
  0x22   :  { %2550 = vmatprep.subr.bf16.mxu0 %v2806_v2  ;;  %2562 = vmatprep.subr.bf16.mxu1 %v2806_v2 }
  0x23   :  { %2138 = vmatprep.mubr.msk.f32.mxu0 %vm2807_vm0, %v2808_v4 }
  0xe7   :  { %v2093_v35 = vpop.f32.mrb[0].mxu0  ;;  %v265_v36 = vpop.f32.mrb[0].mxu1 }
  0xe8   :  { %v149_v37 = vpop.f32.mrb[1].mxu0  ;;  %v2121_v38 = vpop.f32.mrb[1].mxu1  ;;  %v155_v48 = vadd.f32 %v2093_v35, %v2989_v34  ;;  %v1119_v35 = vld [vmem:[%s3351_s6 + $0x10] sm:$0xff] }
  0xe9   :  { %v150_v39 = vadd.f32 %v2989_v34, %v149_v37  ;;  %v1121_v38 = vld [vmem:[%s3351_s6 + $0x20] sm:$0xff] }
  0xeb   :  { %v269_v40 = vadd.f32 %v265_v36, %v150_v39  ;;  %v2096_v42 = vpop.f32.mrb[2].mxu0  ;;  %v1120_v36 = vld [vmem:[%s3351_s6 + $0x18] sm:$0xff]  ;;  %v1122_v39 = vld [vmem:[%s3351_s6 + $0x28] sm:$0xff] }
  0xec   :  { %v159_v43 = vpop.f32.mrb[3].mxu0  ;;  %v165_v58 = vadd.f32 %v2096_v42, %v2989_v34  ;;  %v3124_v37 = vpack.c.bf16 %v1120_v36, %v1119_v35  ;;  %v1124_v42 = vld [vmem:[%s3351_s6 + $0x38] sm:$0xff] }
  0xed   :  { %2774 = vtanh.f32 %v269_v40  ;;  %v160_v53 = vadd.f32 %v2989_v34, %v159_v43  ;;  %v3134_v40 = vpack.c.bf16 %v1122_v39, %v1121_v38 }
  0xef   :  { %v3005_v44 = vpop.f32.mrb[4].mxu0 }
  0xf0   :  { %v169_v45 = vpop.f32.mrb[5].mxu0  ;;  %v175_v6 = vadd.f32 %v3005_v44, %v2989_v34 }
  0xf1   :  { %v170_v63 = vadd.f32 %v2989_v34, %v169_v45 }
  0xf3   :  { %v3007_v46 = vpop.f32.mrb[6].mxu0 }
  0xf4   :  { %v3009_v47 = vpop.f32.mrb[7].mxu0  ;;  %v185_v44 = vadd.f32 %v3007_v46, %v2989_v34 }
  0xf5   :  { %v180_v11 = vadd.f32 %v2989_v34, %v3009_v47  ;;  %v823_v34 = vld [vmem:[%s3350_s4 + $0x18] sm:$0xff] }
  0xf7   :  { %v2775_v41 = vpop.eup %2774 }
  0xf8   :  { %271 = vst.msk [vmem:[#allocation2] sm:$0xff] %vm58_vm1, %v2775_v41  ;;  %272 = vst.msk [vmem:[#allocation3 + $0x38] sm:$0xff] %vm58_vm1, %v2775_v41  ;;  %2139 = vmatmul.mubr.msk.f32.vlgmr.msra.gmra.mrb[8].mxu0 %vm58_vm1, %v2775_v41  ;;  %v1123_v41 = vld [vmem:[%s3351_s6 + $0x30] sm:$0xff] }
  0xf9   :  { %2552 = vmatpush3.bf16.msra.mxu0 %v2886_v9  ;;  %2176 = vmatprep.mubr.msk.f32.mxu0 %vm2807_vm0, %v2808_v4  ;;  %v3144_v43 = vpack.c.bf16 %v1124_v42, %v1123_v41 }
  0xfa   :  { %2553 = vmatprep.subr.bf16.mxu0 %v2806_v2 }
  0xfd   :  { %2555 = vmatpush3.bf16.msra.mxu0 %v2901_v15 }
  0xfe   :  { %2556 = vmatprep.subr.bf16.mxu0 %v2806_v2 }
 0x101   :  { %2558 = vmatpush3.bf16.msra.mxu0 %v2921_v22 }
 0x102   :  { %2559 = vmatprep.subr.bf16.mxu0 %v2806_v2 }
 0x105   :  { %2561 = vmatpush3.bf16.msra.mxu0 %v2931_v26 }
 0x106   :  { %2574 = vmatprep.subr.bf16.mxu0 %v2806_v2 }
 0x1cb   :  { %v342_v49 = vpop.f32.mrb[8].mxu0 }
 0x1cc   :  { %v346_v50 = vadd.f32 %v342_v49, %v155_v48  ;;  %v2140_v51 = vpop.f32.mrb[9].mxu0 }
 0x1ce   :  { %2776 = vtanh.f32 %v346_v50  ;;  %v822_v50 = vld [vmem:[%s3350_s4 + $0x10] sm:$0xff] }
 0x1cf   :  { %v2630_v51 = vpack.c.bf16 %v823_v34, %v822_v50 }
 0x1d8   :  { %v2777_v52 = vpop.eup %2776 }
 0x1d9   :  { %348 = vst.msk [vmem:[#allocation2 + $0x8] sm:$0xff] %vm58_vm1, %v2777_v52  ;;  %349 = vst.msk [vmem:[#allocation3 + $0x30] sm:$0xff] %vm58_vm1, %v2777_v52  ;;  %2158 = vmatmul.mubr.msk.f32.vlgmr.msra.gmra.mrb[2].mxu1 %vm58_vm1, %v2777_v52 }
 0x1da   :  { %2564 = vmatpush3.bf16.msra.mxu1 %v2886_v9  ;;  %2195 = vmatprep.mubr.msk.f32.mxu1 %vm2807_vm0, %v2808_v4 }
 0x1db   :  { %2565 = vmatprep.subr.bf16.mxu1 %v2806_v2 }
 0x1de   :  { %2567 = vmatpush3.bf16.msra.mxu1 %v2901_v15 }
 0x1df   :  { %2568 = vmatprep.subr.bf16.mxu1 %v2806_v2 }
 0x1e2   :  { %2570 = vmatpush3.bf16.msra.mxu1 %v2921_v22 }
 0x1e3   :  { %2571 = vmatprep.subr.bf16.mxu1 %v2806_v2 }
 0x1e6   :  { %2573 = vmatpush3.bf16.msra.mxu1 %v2931_v26 }
 0x1e7   :  { %2586 = vmatprep.subr.bf16.mxu1 %v2806_v2 }
 0x2ac   :  { %v419_v54 = vpop.f32.mrb[2].mxu1 }
 0x2ad   :  { %v423_v55 = vadd.f32 %v419_v54, %v160_v53  ;;  %v2159_v56 = vpop.f32.mrb[3].mxu1  ;;  %v824_v53 = vld [vmem:[%s3350_s4 + $0x20] sm:$0xff]  ;;  %v825_v54 = vld [vmem:[%s3350_s4 + $0x28] sm:$0xff] }
 0x2ae   :  { %v2634_v56 = vpack.c.bf16 %v825_v54, %v824_v53 }
 0x2af   :  { %2778 = vtanh.f32 %v423_v55 }
 0x2b9   :  { %v2779_v57 = vpop.eup %2778 }
 0x2ba   :  { %425 = vst.msk [vmem:[#allocation2 + $0x10] sm:$0xff] %vm58_vm1, %v2779_v57  ;;  %426 = vst.msk [vmem:[#allocation3 + $0x28] sm:$0xff] %vm58_vm1, %v2779_v57  ;;  %2177 = vmatmul.mubr.msk.f32.vlgmr.msra.gmra.mrb[10].mxu0 %vm58_vm1, %v2779_v57 }
 0x2bb   :  { %2576 = vmatpush3.bf16.msra.mxu0 %v2886_v9  ;;  %2214 = vmatprep.mubr.msk.f32.mxu0 %vm2807_vm0, %v2808_v4 }
 0x2bc   :  { %2577 = vmatprep.subr.bf16.mxu0 %v2806_v2 }
 0x2bf   :  { %2579 = vmatpush3.bf16.msra.mxu0 %v2901_v15 }
 0x2c0   :  { %2580 = vmatprep.subr.bf16.mxu0 %v2806_v2 }
 0x2c3   :  { %2582 = vmatpush3.bf16.msra.mxu0 %v2921_v22 }
 0x2c4   :  { %2583 = vmatprep.subr.bf16.mxu0 %v2806_v2 }
 0x2c7   :  { %2585 = vmatpush3.bf16.msra.mxu0 %v2931_v26 }
 0x2c8   :  { %2598 = vmatprep.subr.bf16.mxu0 %v2806_v2 }
 0x38d   :  { %v496_v59 = vpop.f32.mrb[10].mxu0 }
 0x38e   :  { %v500_v60 = vadd.f32 %v496_v59, %v165_v58  ;;  %v2178_v61 = vpop.f32.mrb[11].mxu0  ;;  %v826_v58 = vld [vmem:[%s3350_s4 + $0x30] sm:$0xff]  ;;  %v827_v59 = vld [vmem:[%s3350_s4 + $0x38] sm:$0xff] }
 0x38f   :  { %v2638_v61 = vpack.c.bf16 %v827_v59, %v826_v58  ;;  %v1728_v58 = vld [vmem:[%s3353_s8 + $0x8] sm:$0xff] }
 0x390   :  { %2780 = vtanh.f32 %v500_v60 }
 0x39a   :  { %v2781_v62 = vpop.eup %2780 }
 0x39b   :  { %502 = vst.msk [vmem:[#allocation2 + $0x18] sm:$0xff] %vm58_vm1, %v2781_v62  ;;  %503 = vst.msk [vmem:[#allocation3 + $0x20] sm:$0xff] %vm58_vm1, %v2781_v62  ;;  %2196 = vmatmul.mubr.msk.f32.vlgmr.msra.gmra.mrb[4].mxu1 %vm58_vm1, %v2781_v62  ;;  %v833_v62 = vld [vmem:[#allocation3 + $0x28] sm:$0xff] }
 0x39c   :  { %2588 = vmatpush3.bf16.msra.mxu1 %v2886_v9  ;;  %2233 = vmatprep.mubr.msk.f32.mxu1 %vm2807_vm0, %v2808_v4 }
 0x39d   :  { %2589 = vmatprep.subr.bf16.mxu1 %v2806_v2 }
 0x3a0   :  { %2591 = vmatpush3.bf16.msra.mxu1 %v2901_v15 }
 0x3a1   :  { %2592 = vmatprep.subr.bf16.mxu1 %v2806_v2 }
 0x3a2   :  { %v832_v60 = vld [vmem:[#allocation3 + $0x20] sm:$0xff] }
 0x3a4   :  { %2594 = vmatpush3.bf16.msra.mxu1 %v2921_v22 }
 0x3a5   :  { %2595 = vmatprep.subr.bf16.mxu1 %v2806_v2 }
 0x3a8   :  { %2597 = vmatpush3.bf16.msra.mxu1 %v2931_v26 }
 0x3a9   :  { %2611 = vmatprep.subr.bf16.mxu1 %v2610_v18 }
 0x46e   :  { %v573_v0 = vpop.f32.mrb[4].mxu1 }
 0x46f   :  { %v577_v1 = vadd.f32 %v573_v0, %v170_v63  ;;  %v2197_v3 = vpop.f32.mrb[5].mxu1  ;;  %v834_v63 = vld [vmem:[#allocation3 + $0x30] sm:$0xff]  ;;  %v835_v0 = vld [vmem:[#allocation3 + $0x38] sm:$0xff] }
 0x470   :  { %v813_v3 = vld [vmem:[#allocation2 + $0x8] sm:$0xff] }
 0x471   :  { %2782 = vtanh.f32 %v577_v1  ;;  %v812_v1 = vld [vmem:[#allocation2] sm:$0xff] }
 0x47b   :  { %v2783_v5 = vpop.eup %2782 }
 0x47c   :  { %579 = vst.msk [vmem:[#allocation2 + $0x20] sm:$0xff] %vm58_vm1, %v2783_v5  ;;  %580 = vst.msk [vmem:[#allocation3 + $0x18] sm:$0xff] %vm58_vm1, %v2783_v5  ;;  %2215 = vmatmul.mubr.msk.f32.vlgmr.msra.gmra.mrb[12].mxu0 %vm58_vm1, %v2783_v5  ;;  %v814_v5 = vld [vmem:[#allocation2 + $0x10] sm:$0xff] }
 0x47d   :  { %2600 = vmatpush3.bf16.msra.mxu0 %v2886_v9  ;;  %2252 = vmatprep.mubr.msk.f32.mxu0 %vm2807_vm0, %v2808_v4 }
 0x47e   :  { %2601 = vmatprep.subr.bf16.mxu0 %v2806_v2 }
 0x481   :  { %2603 = vmatpush3.bf16.msra.mxu0 %v2901_v15 }
 0x482   :  { %2604 = vmatprep.subr.bf16.mxu0 %v2806_v2 }
 0x483   :  { %v831_v57 = vld [vmem:[#allocation3 + $0x18] sm:$0xff] }
 0x485   :  { %2606 = vmatpush3.bf16.msra.mxu0 %v2921_v22  ;;  %v840_v22 = vld [vmem:[%s3349_s5 + $0x20] sm:$0xff] }
 0x486   :  { %2607 = vmatprep.subr.bf16.mxu0 %v2806_v2  ;;  %v2618_v24 = vpack.c.bf16 %v841_v23, %v840_v22 }
 0x489   :  { %2609 = vmatpush3.bf16.msra.mxu0 %v2931_v26  ;;  %v843_v26 = vld [vmem:[%s3349_s5 + $0x38] sm:$0xff] }
 0x48a   :  { %2642 = vmatprep.subr.bf16.mxu0 %v2806_v2  ;;  %v2622_v27 = vpack.c.bf16 %v843_v26, %v842_v25 }
 0x54f   :  { %v650_v7 = vpop.f32.mrb[12].mxu0 }
 0x550   :  { %v654_v8 = vadd.f32 %v650_v7, %v175_v6  ;;  %v2216_v9 = vpop.f32.mrb[13].mxu0  ;;  %v815_v6 = vld [vmem:[#allocation2 + $0x18] sm:$0xff]  ;;  %v816_v7 = vld [vmem:[#allocation2 + $0x20] sm:$0xff] }
 0x552   :  { %2784 = vtanh.f32 %v654_v8 }
 0x55c   :  { %v2785_v10 = vpop.eup %2784 }
 0x55d   :  { %656 = vst.msk [vmem:[#allocation2 + $0x28] sm:$0xff] %vm58_vm1, %v2785_v10  ;;  %657 = vst.msk [vmem:[#allocation3 + $0x10] sm:$0xff] %vm58_vm1, %v2785_v10  ;;  %2234 = vmatmul.mubr.msk.f32.vlgmr.msra.gmra.mrb[6].mxu1 %vm58_vm1, %v2785_v10 }
 0x55e   :  { %2613 = vmatpush3.bf16.msra.mxu1 %v2610_v18 }
 0x55f   :  { %2615 = vmatprep.subr.bf16.mxu1 %v2614_v21 }
 0x562   :  { %2617 = vmatpush3.bf16.msra.mxu1 %v2614_v21 }
 0x563   :  { %2619 = vmatprep.subr.bf16.mxu1 %v2618_v24 }
 0x564   :  { %v830_v55 = vld [vmem:[#allocation3 + $0x10] sm:$0xff]  ;;  %v817_v8 = vld [vmem:[#allocation2 + $0x28] sm:$0xff] }
 0x566   :  { %2621 = vmatpush3.bf16.msra.mxu1 %v2618_v24 }
 0x567   :  { %2623 = vmatprep.subr.bf16.mxu1 %v2622_v27 }
 0x56a   :  { %2625 = vmatpush3.bf16.msra.mxu1 %v2622_v27 }
 0x56b   :  { %2627 = vmatprep.subr.bf16.mxu1 %v2626_v30 }
 0x630   :  { %v727_v12 = vpop.f32.mrb[6].mxu1 }
 0x631   :  { %v731_v13 = vadd.f32 %v727_v12, %v180_v11  ;;  %v2235_v14 = vpop.f32.mrb[7].mxu1 }
 0x633   :  { %2786 = vtanh.f32 %v731_v13  ;;  %v1857_v13 = vld [vmem:[%s3352_s7] ss:$0 sm:$0xff] }
 0x63d   :  { %v2787_v15 = vpop.eup %2786 }
 0x63e   :  { %733 = vst.msk [vmem:[#allocation2 + $0x30] sm:$0xff] %vm58_vm1, %v2787_v15  ;;  %734 = vst.msk [vmem:[#allocation3 + $0x8] sm:$0xff] %vm58_vm1, %v2787_v15  ;;  %2253 = vmatmul.mubr.msk.f32.vlgmr.msra.gmra.mrb[14].mxu0 %vm58_vm1, %v2787_v15 }
 0x63f   :  { %2327 = vmatprep.mubr.msk.f32.mxu0 %vm2807_vm0, %v2808_v4  ;;  %2644 = vmatpush3.bf16.msra.mxu0 %v3114_v33 }
 0x640   :  { %2645 = vmatprep.subr.bf16.mxu0 %v2806_v2 }
 0x643   :  { %2647 = vmatpush3.bf16.msra.mxu0 %v3124_v37 }
 0x644   :  { %2648 = vmatprep.subr.bf16.mxu0 %v2806_v2 }
 0x645   :  { %v829_v52 = vld [vmem:[#allocation3 + $0x8] sm:$0xff]  ;;  %v818_v9 = vld [vmem:[#allocation2 + $0x30] sm:$0xff] }
 0x647   :  { %2650 = vmatpush3.bf16.msra.mxu0 %v3134_v40 }
 0x648   :  { %2651 = vmatprep.subr.bf16.mxu0 %v2806_v2 }
 0x64b   :  { %2653 = vmatpush3.bf16.msra.mxu0 %v3144_v43 }
 0x64c   :  { %2654 = vmatprep.subr.bf16.mxu0 %v2806_v2 }
 0x64e   :  { %2328 = vmatmul.mubr.f32.vlgmr.msra.gmra.mrb[16].mxu0 %v2808_v4 }
 0x64f   :  { %2656 = vmatpush3.bf16.msra.mxu0 %v3114_v33  ;;  %2346 = vmatprep.mubr.msk.f32.mxu0 %vm2807_vm0, %v2808_v4 }
 0x650   :  { %2657 = vmatprep.subr.bf16.mxu0 %v2806_v2 }
 0x653   :  { %2659 = vmatpush3.bf16.msra.mxu0 %v3124_v37 }
 0x654   :  { %2660 = vmatprep.subr.bf16.mxu0 %v2806_v2 }
 0x657   :  { %2662 = vmatpush3.bf16.msra.mxu0 %v3134_v40 }
 0x658   :  { %2663 = vmatprep.subr.bf16.mxu0 %v2806_v2 }
 0x65b   :  { %2665 = vmatpush3.bf16.msra.mxu0 %v3144_v43 }
 0x65c   :  { %2678 = vmatprep.subr.bf16.mxu0 %v2806_v2 }
 0x711   :  { %v804_v45 = vpop.f32.mrb[14].mxu0 }
 0x712   :  { %v808_v47 = vadd.f32 %v804_v45, %v185_v44  ;;  %v2254_v48 = vpop.f32.mrb[15].mxu0 }
 0x714   :  { %2788 = vtanh.f32 %v808_v47 }
 0x71e   :  { %v3161_v49 = vpop.eup %2788 }
 0x71f   :  { %810 = vst.msk [vmem:[#allocation2 + $0x38] sm:$0xff] %vm58_vm1, %v3161_v49  ;;  %811 = vst.msk [vmem:[#allocation3] sm:$0xff] %vm58_vm1, %v3161_v49 }
 0x721   :  { %v1191_v11 = vpop.f32.mrb[16].mxu0 }
 0x722   :  { %v2329_v12 = vpop.f32.mrb[17].mxu0 }
 0x723   :  { %v1739_v12 = vld [vmem:[%s3353_s8 + $0x60] sm:$0xff] }
 0x726   :  { %v828_v46 = vld [vmem:[#allocation3] sm:$0xff]  ;;  %v819_v10 = vld [vmem:[#allocation2 + $0x38] sm:$0xff] }
 0x727   :  { %2271 = vmatprep.mubr.msk.f32.mxu1 %vm58_vm1, %v828_v46 }
 0x728   :  { %2272 = vmatmul.mubr.msk.f32.vlgmr.msra.gmra.mrb[8].mxu1 %vm58_vm1, %v829_v52 }
 0x729   :  { %2629 = vmatpush3.bf16.msra.mxu1 %v2626_v30  ;;  %2274 = vmatprep.mubr.msk.f32.mxu1 %vm58_vm1, %v830_v55 }
 0x72a   :  { %2631 = vmatprep.subr.bf16.mxu1 %v2630_v51 }
 0x72c   :  { %2275 = vmatmul.mubr.msk.f32.gmra.mrb[10].mxu1 %vm58_vm1, %v831_v57 }
 0x72d   :  { %2633 = vmatpush3.bf16.msra.mxu1 %v2630_v51  ;;  %2277 = vmatprep.mubr.msk.f32.mxu1 %vm58_vm1, %v832_v60  ;;  %v1730_v60 = vld [vmem:[%s3353_s8 + $0x18] sm:$0xff] }
 0x72e   :  { %2635 = vmatprep.subr.bf16.mxu1 %v2634_v56 }
 0x730   :  { %2278 = vmatmul.mubr.msk.f32.gmra.mrb[12].mxu1 %vm58_vm1, %v833_v62  ;;  %v1731_v62 = vld [vmem:[%s3353_s8 + $0x20] sm:$0xff] }
 0x731   :  { %2637 = vmatpush3.bf16.msra.mxu1 %v2634_v56  ;;  %2280 = vmatprep.mubr.msk.f32.mxu1 %vm58_vm1, %v834_v63  ;;  %v1732_v63 = vld [vmem:[%s3353_s8 + $0x28] sm:$0xff] }
 0x732   :  { %2639 = vmatprep.subr.bf16.mxu1 %v2638_v61 }
 0x734   :  { %2281 = vmatmul.mubr.msk.f32.gmra.mrb[14].mxu1 %vm58_vm1, %v835_v0  ;;  %v2745_v0 = vpack.c.bf16 %v1732_v63, %v1731_v62 }
 0x735   :  { %2641 = vmatpush3.bf16.msra.mxu1 %v2638_v61  ;;  %2299 = vmatprep.mubr.msk.f32.mxu1 %vm58_vm1, %v812_v1  ;;  %v1733_v1 = vld [vmem:[%s3353_s8 + $0x30] sm:$0xff] }
 0x736   :  { %2666 = vmatprep.subr.bf16.mxu1 %v2806_v2 }
 0x738   :  { %2300 = vmatmul.mubr.msk.f32.vlgmr.msra.gmra.mrb[8].mxu1 %vm58_vm1, %v813_v3  ;;  %v1734_v3 = vld [vmem:[%s3353_s8 + $0x38] sm:$0xff] }
 0x739   :  { %2302 = vmatprep.mubr.msk.f32.mxu1 %vm58_vm1, %v814_v5  ;;  %2668 = vmatpush3.bf16.msra.mxu1 %v3114_v33  ;;  %v2748_v5 = vpack.c.bf16 %v1734_v3, %v1733_v1 }
 0x73a   :  { %2669 = vmatprep.subr.bf16.mxu1 %v2806_v2 }
 0x73c   :  { %2303 = vmatmul.mubr.msk.f32.gmra.mrb[10].mxu1 %vm58_vm1, %v815_v6  ;;  %v1735_v6 = vld [vmem:[%s3353_s8 + $0x40] sm:$0xff] }
 0x73d   :  { %2305 = vmatprep.mubr.msk.f32.mxu1 %vm58_vm1, %v816_v7  ;;  %2671 = vmatpush3.bf16.msra.mxu1 %v3124_v37  ;;  %v1736_v7 = vld [vmem:[%s3353_s8 + $0x48] sm:$0xff] }
 0x73e   :  { %2672 = vmatprep.subr.bf16.mxu1 %v2806_v2 }
 0x740   :  { %2306 = vmatmul.mubr.msk.f32.gmra.mrb[12].mxu1 %vm58_vm1, %v817_v8  ;;  %v2751_v8 = vpack.c.bf16 %v1736_v7, %v1735_v6 }
 0x741   :  { %2308 = vmatprep.mubr.msk.f32.mxu1 %vm58_vm1, %v818_v9  ;;  %2674 = vmatpush3.bf16.msra.mxu1 %v3134_v40  ;;  %v1737_v9 = vld [vmem:[%s3353_s8 + $0x50] sm:$0xff] }
 0x742   :  { %2675 = vmatprep.subr.bf16.mxu1 %v2806_v2 }
 0x744   :  { %2309 = vmatmul.mubr.msk.f32.gmra.mrb[14].mxu1 %vm58_vm1, %v819_v10  ;;  %v1738_v10 = vld [vmem:[%s3353_s8 + $0x58] sm:$0xff] }
 0x745   :  { %2677 = vmatpush3.bf16.msra.mxu1 %v3144_v43  ;;  %2365 = vmatprep.mubr.msk.f32.mxu1 %vm2807_vm0, %v2808_v4 }
 0x746   :  { %2690 = vmatprep.subr.bf16.mxu1 %v2806_v2 }
 0x80b   :  { %v2301_v14 = vpop.f32.mrb[8].mxu1 }
 0x80c   :  { %v1110_v15 = vadd.f32 %v2301_v14, %v1857_v13  ;;  %v1063_v16 = vpop.f32.mrb[9].mxu1 }
 0x80d   :  { %v1109_v17 = vadd.f32 %v1857_v13, %v1063_v16  ;;  %v1742_v16 = vld [vmem:[%s3353_s8 + $0x78] sm:$0xff] }
 0x80f   :  { %v1195_v18 = vadd.f32 %v1191_v11, %v1109_v17  ;;  %v2304_v19 = vpop.f32.mrb[10].mxu1  ;;  %v2754_v11 = vpack.c.bf16 %v1738_v10, %v1737_v9 }
 0x810   :  { %v1112_v20 = vadd.f32 %v2304_v19, %v1857_v13  ;;  %v1073_v21 = vpop.f32.mrb[11].mxu1 }
 0x811   :  { %2790 = vtanh.f32 %v1195_v18  ;;  %v1111_v22 = vadd.f32 %v1857_v13, %v1073_v21 }
 0x813   :  { %v2307_v23 = vpop.f32.mrb[12].mxu1 }
 0x814   :  { %v3215_v24 = vadd.f32 %v2307_v23, %v1857_v13  ;;  %v1083_v25 = vpop.f32.mrb[13].mxu1 }
 0x815   :  { %v1113_v26 = vadd.f32 %v1857_v13, %v1083_v25 }
 0x817   :  { %v2310_v27 = vpop.f32.mrb[14].mxu1 }
 0x818   :  { %v3217_v28 = vadd.f32 %v2310_v27, %v1857_v13  ;;  %v1093_v29 = vpop.f32.mrb[15].mxu1 }
 0x819   :  { %v3219_v30 = vadd.f32 %v1857_v13, %v1093_v29  ;;  %v1740_v13 = vld [vmem:[%s3353_s8 + $0x68] sm:$0xff] }
 0x81a   :  { %v2757_v14 = vpack.c.bf16 %v1740_v13, %v1739_v12 }
 0x81b   :  { %v2791_v31 = vpop.eup %2790 }
 0x81c   :  { %2347 = vmatmul.mubr.msk.f32.vlgmr.msra.gmra.mrb[18].mxu0 %vm58_vm1, %v2791_v31 }
 0x81d   :  { %2680 = vmatpush3.bf16.msra.mxu0 %v3114_v33  ;;  %2384 = vmatprep.mubr.msk.f32.mxu0 %vm2807_vm0, %v2808_v4 }
 0x81e   :  { %2681 = vmatprep.subr.bf16.mxu0 %v2806_v2 }
 0x821   :  { %2683 = vmatpush3.bf16.msra.mxu0 %v3124_v37 }
 0x822   :  { %2684 = vmatprep.subr.bf16.mxu0 %v2806_v2 }
 0x825   :  { %2686 = vmatpush3.bf16.msra.mxu0 %v3134_v40 }
 0x826   :  { %2687 = vmatprep.subr.bf16.mxu0 %v2806_v2 }
 0x829   :  { %2689 = vmatpush3.bf16.msra.mxu0 %v3144_v43 }
 0x82a   :  { %2702 = vmatprep.subr.bf16.mxu0 %v2806_v2 }
 0x8ef   :  { %v1266_v32 = vpop.f32.mrb[18].mxu0 }
 0x8f0   :  { %v1270_v35 = vadd.f32 %v1266_v32, %v1110_v15  ;;  %v2348_v36 = vpop.f32.mrb[19].mxu0  ;;  %v1741_v15 = vld [vmem:[%s3353_s8 + $0x70] sm:$0xff] }
 0x8f1   :  { %v2760_v17 = vpack.c.bf16 %v1742_v16, %v1741_v15 }
 0x8f2   :  { %2792 = vtanh.f32 %v1270_v35 }
 0x8fc   :  { %v2793_v38 = vpop.eup %2792 }
 0x8fd   :  { %2366 = vmatmul.mubr.msk.f32.vlgmr.msra.gmra.mrb[16].mxu1 %vm58_vm1, %v2793_v38 }
 0x8fe   :  { %2692 = vmatpush3.bf16.msra.mxu1 %v3114_v33  ;;  %2403 = vmatprep.mubr.msk.f32.mxu1 %vm2807_vm0, %v2808_v4 }
 0x8ff   :  { %2693 = vmatprep.subr.bf16.mxu1 %v2806_v2 }
 0x902   :  { %2695 = vmatpush3.bf16.msra.mxu1 %v3124_v37 }
 0x903   :  { %2696 = vmatprep.subr.bf16.mxu1 %v2806_v2 }
 0x906   :  { %2698 = vmatpush3.bf16.msra.mxu1 %v3134_v40 }
 0x907   :  { %2699 = vmatprep.subr.bf16.mxu1 %v2806_v2 }
 0x90a   :  { %2701 = vmatpush3.bf16.msra.mxu1 %v3144_v43 }
 0x90b   :  { %2714 = vmatprep.subr.bf16.mxu1 %v2806_v2 }
 0x9d0   :  { %v1341_v39 = vpop.f32.mrb[16].mxu1 }
 0x9d1   :  { %v1345_v41 = vadd.f32 %v1341_v39, %v1111_v22  ;;  %v2367_v42 = vpop.f32.mrb[17].mxu1 }
 0x9d3   :  { %2794 = vtanh.f32 %v1345_v41 }
 0x9dd   :  { %v2795_v44 = vpop.eup %2794 }
 0x9de   :  { %2385 = vmatmul.mubr.msk.f32.vlgmr.msra.gmra.mrb[20].mxu0 %vm58_vm1, %v2795_v44 }
 0x9df   :  { %2704 = vmatpush3.bf16.msra.mxu0 %v3114_v33  ;;  %2422 = vmatprep.mubr.msk.f32.mxu0 %vm2807_vm0, %v2808_v4 }
 0x9e0   :  { %2705 = vmatprep.subr.bf16.mxu0 %v2806_v2 }
 0x9e3   :  { %2707 = vmatpush3.bf16.msra.mxu0 %v3124_v37 }
 0x9e4   :  { %2708 = vmatprep.subr.bf16.mxu0 %v2806_v2 }
 0x9e7   :  { %2710 = vmatpush3.bf16.msra.mxu0 %v3134_v40 }
 0x9e8   :  { %2711 = vmatprep.subr.bf16.mxu0 %v2806_v2 }
 0x9eb   :  { %2713 = vmatpush3.bf16.msra.mxu0 %v3144_v43 }
 0x9ec   :  { %2726 = vmatprep.subr.bf16.mxu0 %v2806_v2 }
 0xab1   :  { %v1416_v45 = vpop.f32.mrb[20].mxu0 }
 0xab2   :  { %v1420_v47 = vadd.f32 %v1416_v45, %v1112_v20  ;;  %v2386_v48 = vpop.f32.mrb[21].mxu0 }
 0xab4   :  { %2796 = vtanh.f32 %v1420_v47 }
 0xabe   :  { %v2797_v50 = vpop.eup %2796 }
 0xabf   :  { %2404 = vmatmul.mubr.msk.f32.vlgmr.msra.gmra.mrb[18].mxu1 %vm58_vm1, %v2797_v50 }
 0xac0   :  { %2716 = vmatpush3.bf16.msra.mxu1 %v3114_v33  ;;  %2441 = vmatprep.mubr.msk.f32.mxu1 %vm2807_vm0, %v2808_v4 }
 0xac1   :  { %2717 = vmatprep.subr.bf16.mxu1 %v2806_v2 }
 0xac4   :  { %2719 = vmatpush3.bf16.msra.mxu1 %v3124_v37 }
 0xac5   :  { %2720 = vmatprep.subr.bf16.mxu1 %v2806_v2 }
 0xac8   :  { %2722 = vmatpush3.bf16.msra.mxu1 %v3134_v40 }
 0xac9   :  { %2723 = vmatprep.subr.bf16.mxu1 %v2806_v2 }
 0xacc   :  { %2725 = vmatpush3.bf16.msra.mxu1 %v3144_v43 }
 0xacd   :  { %2738 = vmatprep.subr.bf16.mxu1 %v2806_v2 }
 0xb92   :  { %v1491_v34 = vpop.f32.mrb[18].mxu1 }
 0xb93   :  { %v1495_v46 = vadd.f32 %v1491_v34, %v1113_v26  ;;  %v2405_v51 = vpop.f32.mrb[19].mxu1 }
 0xb95   :  { %2798 = vtanh.f32 %v1495_v46 }
 0xb9f   :  { %v2799_v52 = vpop.eup %2798 }
 0xba0   :  { %2423 = vmatmul.mubr.msk.f32.vlgmr.msra.gmra.mrb[22].mxu0 %vm58_vm1, %v2799_v52 }
 0xba1   :  { %2728 = vmatpush3.bf16.msra.mxu0 %v3114_v33  ;;  %2460 = vmatprep.mubr.msk.f32.mxu0 %vm2807_vm0, %v2808_v4 }
 0xba2   :  { %2729 = vmatprep.subr.bf16.mxu0 %v2806_v2 }
 0xba5   :  { %2731 = vmatpush3.bf16.msra.mxu0 %v3124_v37 }
 0xba6   :  { %2732 = vmatprep.subr.bf16.mxu0 %v2806_v2 }
 0xba9   :  { %2734 = vmatpush3.bf16.msra.mxu0 %v3134_v40 }
 0xbaa   :  { %2735 = vmatprep.subr.bf16.mxu0 %v2806_v2 }
 0xbad   :  { %2737 = vmatpush3.bf16.msra.mxu0 %v3144_v43  ;;  %v1727_v43 = vld [vmem:[%s3353_s8] sm:$0xff] }
 0xbae   :  { %v2739_v59 = vpack.c.bf16 %v1728_v58, %v1727_v43 }
 0xc73   :  { %v1566_v53 = vpop.f32.mrb[22].mxu0 }
 0xc74   :  { %v1570_v54 = vadd.f32 %v1566_v53, %v3215_v24  ;;  %v2424_v55 = vpop.f32.mrb[23].mxu0  ;;  %v1865_v24 = vld [vmem:[%s3354_s9] ss:$0 sm:$0xff] }
 0xc76   :  { %2800 = vtanh.f32 %v1570_v54 }
 0xc80   :  { %v2801_v33 = vpop.eup %2800 }
 0xc81   :  { %2442 = vmatmul.mubr.msk.f32.vlgmr.msra.gmra.mrb[20].mxu1 %vm58_vm1, %v2801_v33 }
 0xc82   :  { %2495 = vmatprep.mubr.msk.f32.mxu1 %vm2807_vm0, %v2808_v4  ;;  %v1729_v4 = vld [vmem:[%s3353_s8 + $0x10] sm:$0xff]  ;;  %2740 = vmatpush3.bf16.msra.mxu1 %v2739_v59 }
 0xc83   :  { %v2742_v61 = vpack.c.bf16 %v1730_v60, %v1729_v4  ;;  %2741 = vmatprep.subr.bf16.mxu1 %v2806_v2 }
 0xc86   :  { %2743 = vmatpush3.bf16.msra.mxu1 %v2742_v61 }
 0xc87   :  { %2744 = vmatprep.subr.bf16.mxu1 %v2806_v2 }
 0xc8a   :  { %2746 = vmatpush3.bf16.msra.mxu1 %v2745_v0 }
 0xc8b   :  { %2747 = vmatprep.subr.bf16.mxu1 %v2806_v2 }
 0xc8e   :  { %2749 = vmatpush3.bf16.msra.mxu1 %v2748_v5 }
 0xc8f   :  { %2750 = vmatprep.subr.bf16.mxu1 %v2806_v2 }
 0xc92   :  { %2752 = vmatpush3.bf16.msra.mxu1 %v2751_v8 }
 0xc93   :  { %2753 = vmatprep.subr.bf16.mxu1 %v2806_v2 }
 0xc96   :  { %2755 = vmatpush3.bf16.msra.mxu1 %v2754_v11 }
 0xc97   :  { %2756 = vmatprep.subr.bf16.mxu1 %v2806_v2 }
 0xc9a   :  { %2758 = vmatpush3.bf16.msra.mxu1 %v2757_v14 }
 0xc9b   :  { %2759 = vmatprep.subr.bf16.mxu1 %v2806_v2 }
 0xc9e   :  { %2761 = vmatpush3.bf16.msra.mxu1 %v2760_v17 }
 0xd54   :  { %v1641_v37 = vpop.f32.mrb[20].mxu1 }
 0xd55   :  { %v1645_v56 = vadd.f32 %v1641_v37, %v3219_v30  ;;  %v2443_v57 = vpop.f32.mrb[21].mxu1 }
 0xd57   :  { %2802 = vtanh.f32 %v1645_v56 }
 0xd61   :  { %v2803_v40 = vpop.eup %2802 }
 0xd62   :  { %2461 = vmatmul.mubr.msk.f32.vlgmr.msra.gmra.mrb[24].mxu0 %vm58_vm1, %v2803_v40 }
 0xe35   :  { %v1716_v18 = vpop.f32.mrb[24].mxu0 }
 0xe36   :  { %v1720_v19 = vadd.f32 %v1716_v18, %v3217_v28  ;;  %v2462_v20 = vpop.f32.mrb[25].mxu0 }
 0xe38   :  { %2804 = vtanh.f32 %v1720_v19 }
 0xe42   :  { %v2805_v21 = vpop.eup %2804 }
 0xe43   :  { %1723 = vrot.lane.b32.xlu0 %v2805_v21, %s2809_s3 }
 0xeb5   :  { %v1724_v22 = vpop.permute.xlu0 %1723 }
 0xeb6   :  { %v1726_v23 = vsel %vm58_vm1, %v3161_v49, %v1724_v22 }
 0xeb7   :  { %2496 = vmatmul.mubr.f32.vlgmr.msra.gmra.mrb[22].mxu1 %v1726_v23 }
 0xf8a   :  { %v1816_v25 = vpop.f32.mrb[22].mxu1 }
 0xf8b   :  { %v1817_v2 = vadd.f32 %v1865_v24, %v1816_v25  ;;  %v2497_v26 = vpop.f32.mrb[23].mxu1 }
 0xf8d   :  { %1820 = vst [vmem:[%s3355_s10] sm:$0xff] %v1817_v2 }

</bundles_post_ra>
